<compile_context>
chip_gen: v7x
topology: tpu7x:2x2x1
jax: 0.10.0
libtpu: 0.0.40
codegen_flags: <defaults>
</compile_context>

<pallas_src>
import string
import functools

import numpy as np
import jax
import jax.numpy as jnp
from jax.experimental import pallas as pl
from jax.experimental.pallas import tpu as pltpu

ENGLISH_ALPHABET = '-0123456789abcdefghijklmnopqrstuvwxyzABCDEFGHIJKLMNOPQRSTUVWXYZ'
ENGLISH_DICT = {c: i for i, c in enumerate(ENGLISH_ALPHABET)}
NUM_CLASSES = len(ENGLISH_ALPHABET)   # 63
PADDED_CLASSES = 128                  # lane-dense class dimension


# ------------------------------------------------------------------ host glue
def str_filt(s, voc_type):
    alpha_dict = {
        'digit': string.digits,
        'lower': string.digits + string.ascii_lowercase,
        'upper': string.digits + string.ascii_letters,
        'all': string.digits + string.ascii_letters + string.punctuation,
    }
    if voc_type == 'lower':
        s = s.lower()
    for char in s:
        if char not in alpha_dict[voc_type]:
            s = s.replace(char, '')
    return s.lower()


def label_encoder(labels):
    # TODO(synk): host-side string encoding (no Pallas equivalent); mirrors the torch code.
    batch = len(labels)
    lengths = [len(l) for l in labels]
    max_length = max(lengths)
    input_tensor = np.zeros((batch, max_length), dtype=np.int32)
    for i in range(batch):
        for j in range(lengths[i] - 1):
            input_tensor[i][j + 1] = ENGLISH_DICT[labels[i][j]]
    text_gt = [ENGLISH_DICT[ch] for l in labels for ch in l]
    return (jnp.array(lengths, jnp.int32),
            jnp.asarray(input_tensor),
            jnp.array(text_gt, jnp.int32))


def _pick_batch_tile(B, L, max_rows=256):
    """Whole batch in one step when it fits the target MXU M; else the largest
    divisor of B whose stacked row count (tb*L) stays within max_rows."""
    if B * L <= max_rows:
        return B
    cands = [tb for tb in range(1, B) if B % tb == 0 and tb * L <= max_rows]
    aligned = [tb for tb in cands if (tb * L) % 8 == 0]
    if aligned:
        return max(aligned)
    return max(cands) if cands else 1


# ----------------------------------------------------------- fused TPU kernel
def _fused_text_focus_kernel(imgs_ref, q_ref, gt_ref,
                             pkt_ref, wk_ref, pv_ref, wv_ref, wout_ref,
                             out_ref, *, tb, seq_len, num_classes,
                             l1_scale, ce_scale):
    """One grid step = TB batch elements.

    imgs_ref : (TB, 6, S)   packed HR (ch 0:3) + SR (ch 3:6) RGB, lane-dense
    q_ref    : (TB*L, D)    stacked decoder query embeddings (fat M)
    gt_ref   : (TB*L, 1)    int32 targets
    pkt_ref  : (D, S)       positional keys (transposed)        [VMEM-resident]
    wk_ref   : (1, D)       pixel key weight                    [VMEM-resident]
    pv_ref   : (S, D)       positional values                   [VMEM-resident]
    wv_ref   : (1, D)       pixel value weight                  [VMEM-resident]
    wout_ref : (D, 128)     zero-padded output projection       [VMEM-resident]
    out_ref  : (1, 1, 1)    per-block partial loss (batch axis is "parallel")
    """
    TBL = tb * seq_len
    S = imgs_ref.shape[-1]
    CP = wout_ref.shape[-1]

    # ---- fused grayscale of packed HR+SR images (no HBM round-trip) ----
    imgs = imgs_ref[...]                                                 # (TB, 6, S)
    gray_hr = (0.299 * imgs[:, 0:1, :] + 0.587 * imgs[:, 1:2, :]
               + 0.114 * imgs[:, 2:3, :])                                # (TB, 1, S)
    gray_sr = (0.299 * imgs[:, 3:4, :] + 0.587 * imgs[:, 4:5, :]
               + 0.114 * imgs[:, 5:6, :])                                # (TB, 1, S)
    gh = jnp.broadcast_to(gray_hr, (tb, seq_len, S)).reshape(TBL, S)
    gs = jnp.broadcast_to(gray_sr, (tb, seq_len, S)).reshape(TBL, S)

    # ---- recognizer score basis: one matmul with M = TB*L rows ----
    q2 = q_ref[...]                                                      # (TBL, D)
    base = jnp.dot(q2, pkt_ref[...], preferred_element_type=jnp.float32)  # (TBL, S)
    qk = jnp.sum(q2 * wk_ref[...], axis=-1, keepdims=True)                # (TBL, 1)

    def _softmax(s):
        m = jnp.max(s, axis=-1, keepdims=True)
        e = jnp.exp(s - m)
        denom = jnp.sum(e, axis=-1, keepdims=True)
        return e * pl.reciprocal(denom, approx=True)

    attn_hr = _softmax(base + qk * gh)                                   # (TBL, S)
    attn_sr = _softmax(base + qk * gs)                                   # (TBL, S)

    # ---- L1 attention loss partial (stays on-chip) ----
    l1_rows = jnp.sum(jnp.abs(attn_hr - attn_sr), axis=-1, keepdims=True)  # (TBL, 1)
    l1_part = jnp.sum(l1_rows, axis=0, keepdims=True)                      # (1, 1)

    # ---- SR recognition branch (HR logits are not needed by the loss) ----
    ag = jnp.sum(attn_sr * gs, axis=-1, keepdims=True)                      # (TBL, 1)
    ctx = ag * wv_ref[...] + jnp.dot(attn_sr, pv_ref[...],
                                     preferred_element_type=jnp.float32)    # (TBL, D)
    logits = jnp.dot(ctx, wout_ref[...],
                     preferred_element_type=jnp.float32)                    # (TBL, CP)

    # in-kernel class padding mask + target gather (no one-hot / bias inputs)
    cls = jax.lax.broadcasted_iota(jnp.int32, (TBL, CP), 1)
    logits = jnp.where(cls < num_classes, logits, -1e9)

    # cross-entropy over the real 63 classes (padded lanes carry -1e9)
    # TODO(synk): `weight_cross_entropy` is undefined in the source; standard CE is used.
    m = jnp.max(logits, axis=-1, keepdims=True)
    lse = jnp.log(jnp.sum(jnp.exp(logits - m), axis=-1, keepdims=True)) + m
    tgt = gt_ref[...]                                                       # (TBL, 1)
    gathered = jnp.sum(jnp.where(cls == tgt, logits, 0.0),
                       axis=-1, keepdims=True)                              # (TBL, 1)
    nll = lse - gathered
    ce_part = jnp.sum(nll, axis=0, keepdims=True)                           # (1, 1)

    # per-block partial of: 10 * mean(L1) + 0.001 * mean(CE)
    out_ref[0] = l1_part * l1_scale + ce_part * ce_scale


def fused_text_focus_loss(imgs, q_flat, gt_flat, p_key_t, w_k, p_val, w_v,
                          w_out_pad, *, batch, seq_len, tb):
    n_blocks = batch // tb
    S = imgs.shape[-1]
    D = q_flat.shape[-1]
    CP = w_out_pad.shape[-1]
    TBL = tb * seq_len

    kernel = functools.partial(
        _fused_text_focus_kernel,
        tb=tb, seq_len=seq_len, num_classes=NUM_CLASSES,
        l1_scale=10.0 / float(batch * seq_len * S),
        ce_scale=0.001 / float(batch * seq_len))

    partials = pl.pallas_call(
        kernel,
        out_shape=jax.ShapeDtypeStruct((n_blocks, 1, 1), jnp.float32),
        grid=(n_blocks,),
        in_specs=[
            pl.BlockSpec((tb, 6, S), lambda b: (b, 0, 0)),     # packed HR+SR RGB
            pl.BlockSpec((TBL, D), lambda b: (b, 0)),          # stacked queries
            pl.BlockSpec((TBL, 1), lambda b: (b, 0)),          # int32 targets
            pl.BlockSpec((D, S), lambda b: (0, 0)),            # p_key_t   (resident)
            pl.BlockSpec((1, D), lambda b: (0, 0)),            # w_k       (resident)
            pl.BlockSpec((S, D), lambda b: (0, 0)),            # p_val     (resident)
            pl.BlockSpec((1, D), lambda b: (0, 0)),            # w_v       (resident)
            pl.BlockSpec((D, CP), lambda b: (0, 0)),           # w_out pad (resident)
        ],
        out_specs=pl.BlockSpec((1, 1, 1), lambda b: (b, 0, 0)),  # per-block partial
        compiler_params=pltpu.CompilerParams(
            dimension_semantics=("parallel",)),
    )(imgs, q_flat, gt_flat, p_key_t, w_k, p_val, w_v, w_out_pad)

    return jnp.sum(partials)


# --------------------------------------------------------------- full module
def init_transformer_params(key, S, D, C):
    ks = jax.random.split(key, 6)
    scale = 0.02
    return {
        'embed':   jax.random.normal(ks[0], (C, D), jnp.float32) * scale,
        'p_key_t': jax.random.normal(ks[1], (D, S), jnp.float32) * scale,
        'w_k':     jax.random.normal(ks[2], (1, D), jnp.float32) * scale,
        'p_val':   jax.random.normal(ks[3], (S, D), jnp.float32) * scale,
        'w_v':     jax.random.normal(ks[4], (1, D), jnp.float32) * scale,
        'w_out':   jax.random.normal(ks[5], (D, C), jnp.float32) * scale,
    }


def text_focus_loss(sr_img, hr_img, labels, params):
    """Mirrors TextFocusLoss.forward."""
    labels = [str_filt(l, 'lower') + '-' for l in labels]
    _, input_ids, text_gt = label_encoder(labels)

    B, _, H, W = sr_img.shape
    S = H * W
    L = input_ids.shape[1]
    D = params['embed'].shape[1]
    C = params['w_out'].shape[1]

    # lane-dense packed image layout: HR channels 0:3, SR channels 3:6, spatial in lanes
    imgs = jnp.concatenate([hr_img.reshape(B, 3, S),
                            sr_img.reshape(B, 3, S)], axis=1)            # (B, 6, S)

    # decoder query embeddings, stacked host-side so every MXU pass sees M = TB*L
    q_flat = jnp.take(params['embed'], input_ids, axis=0).reshape(B * L, D)

    # TODO(synk): flat text_gt only aligns with (B*L) for equal-length labels; the
    # original torch code handles ragged per-sample lengths.
    assert text_gt.shape[0] == B * L
    gt_flat = text_gt.reshape(B * L, 1).astype(jnp.int32)

    # class-dim padding 63 -> 128 for lane-dense logits; padding masked in-kernel
    w_out_pad = jnp.zeros((D, PADDED_CLASSES), jnp.float32).at[:, :C].set(params['w_out'])

    tb = _pick_batch_tile(B, L)
    return fused_text_focus_loss(imgs, q_flat, gt_flat,
                                 params['p_key_t'], params['w_k'],
                                 params['p_val'], params['w_v'], w_out_pad,
                                 batch=B, seq_len=L, tb=tb)


if __name__ == "__main__":
    key = jax.random.PRNGKey(0)
    k_sr, k_hr, k_par = jax.random.split(key, 3)

    B, H, W, D = 2, 16, 16, 32
    sr_img = jax.random.uniform(k_sr, (B, 3, H, W), jnp.float32)
    hr_img = jax.random.uniform(k_hr, (B, 3, H, W), jnp.float32)
    labels = ["hello12", "world99"]   # -> "hello12-", "world99-" (length 8 each)

    params = init_transformer_params(k_par, H * W, D, NUM_CLASSES)

    loss = text_focus_loss(sr_img, hr_img, labels, params)
    loss = jax.block_until_ready(loss)
    assert bool(jnp.isfinite(loss))
    print("KERNEL_OK")
</pallas_src>

<mosaic_0001>
module attributes {stable_mosaic.version = 11 : i64} {
  func.func @_fused_text_focus_kernel(%arg0: i32, %arg1: memref<2x6x256xf32, #tpu.memory_space<vmem>>, %arg2: memref<16x32xf32, #tpu.memory_space<vmem>>, %arg3: memref<16x1xi32, #tpu.memory_space<vmem>>, %arg4: memref<32x256xf32, #tpu.memory_space<vmem>>, %arg5: memref<1x32xf32, #tpu.memory_space<vmem>>, %arg6: memref<256x32xf32, #tpu.memory_space<vmem>>, %arg7: memref<1x32xf32, #tpu.memory_space<vmem>>, %arg8: memref<32x128xf32, #tpu.memory_space<vmem>>, %arg9: memref<1x1x1xf32, #tpu.memory_space<vmem>>) attributes {dimension_semantics = [#tpu.dimension_semantics<parallel>], iteration_bounds = array<i64: 1>, scalar_prefetch = 0 : i64, scratch_operands = 0 : i64, tpu.core_type = #tpu.core_type<tc>, window_params = [{transform_indices = @transform_0, window_bounds = array<i64: 2, 6, 256>}, {transform_indices = @transform_1, window_bounds = array<i64: 16, 32>}, {transform_indices = @transform_2, window_bounds = array<i64: 16, 1>}, {pipeline_mode = #tpu.pipeline_mode<synchronous>, transform_indices = @transform_3, window_bounds = array<i64: 32, 256>}, {pipeline_mode = #tpu.pipeline_mode<synchronous>, transform_indices = @transform_4, window_bounds = array<i64: 1, 32>}, {pipeline_mode = #tpu.pipeline_mode<synchronous>, transform_indices = @transform_5, window_bounds = array<i64: 256, 32>}, {pipeline_mode = #tpu.pipeline_mode<synchronous>, transform_indices = @transform_6, window_bounds = array<i64: 1, 32>}, {pipeline_mode = #tpu.pipeline_mode<synchronous>, transform_indices = @transform_7, window_bounds = array<i64: 32, 128>}, {transform_indices = @transform_8, window_bounds = array<i64: 1, 1, 1>}]} {
    %c0 = arith.constant 0 : index
    %c0_0 = arith.constant 0 : index
    %c0_1 = arith.constant 0 : index
    %0 = vector.load %arg1[%c0, %c0_0, %c0_1] : memref<2x6x256xf32, #tpu.memory_space<vmem>>, vector<2x6x256xf32>
    %1 = vector.extract_strided_slice %0 {offsets = [0, 0, 0], sizes = [2, 1, 256], strides = [1, 1, 1]} : vector<2x6x256xf32> to vector<2x1x256xf32>
    %cst = arith.constant 2.990000e-01 : f32
    %2 = vector.broadcast %cst : f32 to vector<2x1x256xf32>
    %3 = arith.mulf %2, %1 : vector<2x1x256xf32>
    %4 = vector.extract_strided_slice %0 {offsets = [0, 1, 0], sizes = [2, 1, 256], strides = [1, 1, 1]} : vector<2x6x256xf32> to vector<2x1x256xf32>
    %cst_2 = arith.constant 5.870000e-01 : f32
    %5 = vector.broadcast %cst_2 : f32 to vector<2x1x256xf32>
    %6 = arith.mulf %5, %4 : vector<2x1x256xf32>
    %7 = arith.addf %3, %6 : vector<2x1x256xf32>
    %8 = vector.extract_strided_slice %0 {offsets = [0, 2, 0], sizes = [2, 1, 256], strides = [1, 1, 1]} : vector<2x6x256xf32> to vector<2x1x256xf32>
    %cst_3 = arith.constant 1.140000e-01 : f32
    %9 = vector.broadcast %cst_3 : f32 to vector<2x1x256xf32>
    %10 = arith.mulf %9, %8 : vector<2x1x256xf32>
    %11 = arith.addf %7, %10 : vector<2x1x256xf32>
    %12 = vector.extract_strided_slice %0 {offsets = [0, 3, 0], sizes = [2, 1, 256], strides = [1, 1, 1]} : vector<2x6x256xf32> to vector<2x1x256xf32>
    %cst_4 = arith.constant 2.990000e-01 : f32
    %13 = vector.broadcast %cst_4 : f32 to vector<2x1x256xf32>
    %14 = arith.mulf %13, %12 : vector<2x1x256xf32>
    %15 = vector.extract_strided_slice %0 {offsets = [0, 4, 0], sizes = [2, 1, 256], strides = [1, 1, 1]} : vector<2x6x256xf32> to vector<2x1x256xf32>
    %cst_5 = arith.constant 5.870000e-01 : f32
    %16 = vector.broadcast %cst_5 : f32 to vector<2x1x256xf32>
    %17 = arith.mulf %16, %15 : vector<2x1x256xf32>
    %18 = arith.addf %14, %17 : vector<2x1x256xf32>
    %19 = vector.extract_strided_slice %0 {offsets = [0, 5, 0], sizes = [2, 1, 256], strides = [1, 1, 1]} : vector<2x6x256xf32> to vector<2x1x256xf32>
    %cst_6 = arith.constant 1.140000e-01 : f32
    %20 = vector.broadcast %cst_6 : f32 to vector<2x1x256xf32>
    %21 = arith.mulf %20, %19 : vector<2x1x256xf32>
    %22 = arith.addf %18, %21 : vector<2x1x256xf32>
    %23 = vector.shape_cast %11 : vector<2x1x256xf32> to vector<2x1x256xf32>
    %24 = vector.broadcast %23 : vector<2x1x256xf32> to vector<2x8x256xf32>
    %25 = vector.shape_cast %24 : vector<2x8x256xf32> to vector<16x256xf32>
    %26 = vector.shape_cast %22 : vector<2x1x256xf32> to vector<2x1x256xf32>
    %27 = vector.broadcast %26 : vector<2x1x256xf32> to vector<2x8x256xf32>
    %28 = vector.shape_cast %27 : vector<2x8x256xf32> to vector<16x256xf32>
    %c0_7 = arith.constant 0 : index
    %c0_8 = arith.constant 0 : index
    %29 = vector.load %arg2[%c0_7, %c0_8] : memref<16x32xf32, #tpu.memory_space<vmem>>, vector<16x32xf32>
    %c0_9 = arith.constant 0 : index
    %c0_10 = arith.constant 0 : index
    %30 = vector.load %arg4[%c0_9, %c0_10] : memref<32x256xf32, #tpu.memory_space<vmem>>, vector<32x256xf32>
    %cst_11 = arith.constant dense<0.000000e+00> : vector<16x256xf32>
    %31 = tpu.matmul %29, %30, %cst_11 {dimension_numbers = #tpu.dot_dimension_numbers<[1], [0], [0], [1], [0, 0, 1, 1], [], []>} : vector<16x32xf32>, vector<32x256xf32>, vector<16x256xf32> -> vector<16x256xf32>
    %c0_12 = arith.constant 0 : index
    %c0_13 = arith.constant 0 : index
    %32 = vector.load %arg5[%c0_12, %c0_13] : memref<1x32xf32, #tpu.memory_space<vmem>>, vector<1x32xf32>
    %33 = vector.broadcast %32 : vector<1x32xf32> to vector<16x32xf32>
    %34 = arith.mulf %29, %33 : vector<16x32xf32>
    %cst_14 = arith.constant dense<0.000000e+00> : vector<16xf32>
    %35 = vector.multi_reduction <add>, %34, %cst_14 [1] : vector<16x32xf32> to vector<16xf32>
    %36 = vector.shape_cast %35 : vector<16xf32> to vector<16x1xf32>
    %37 = vector.broadcast %36 : vector<16x1xf32> to vector<16x256xf32>
    %38 = arith.mulf %37, %25 : vector<16x256xf32>
    %39 = arith.addf %31, %38 : vector<16x256xf32>
    %cst_15 = arith.constant dense<0xFF800000> : vector<16xf32>
    %40 = vector.multi_reduction <maximumf>, %39, %cst_15 [1] : vector<16x256xf32> to vector<16xf32>
    %41 = vector.shape_cast %40 : vector<16xf32> to vector<16x1xf32>
    %42 = vector.broadcast %41 : vector<16x1xf32> to vector<16x256xf32>
    %43 = arith.subf %39, %42 : vector<16x256xf32>
    %44 = math.exp %43 : vector<16x256xf32>
    %cst_16 = arith.constant dense<0.000000e+00> : vector<16xf32>
    %45 = vector.multi_reduction <add>, %44, %cst_16 [1] : vector<16x256xf32> to vector<16xf32>
    %46 = vector.shape_cast %45 : vector<16xf32> to vector<16x1xf32>
    %47 = tpu.reciprocal %46 {approx = true} : vector<16x1xf32> -> vector<16x1xf32>
    %48 = vector.broadcast %47 : vector<16x1xf32> to vector<16x256xf32>
    %49 = arith.mulf %44, %48 : vector<16x256xf32>
    %50 = vector.broadcast %36 : vector<16x1xf32> to vector<16x256xf32>
    %51 = arith.mulf %50, %28 : vector<16x256xf32>
    %52 = arith.addf %31, %51 : vector<16x256xf32>
    %cst_17 = arith.constant dense<0xFF800000> : vector<16xf32>
    %53 = vector.multi_reduction <maximumf>, %52, %cst_17 [1] : vector<16x256xf32> to vector<16xf32>
    %54 = vector.shape_cast %53 : vector<16xf32> to vector<16x1xf32>
    %55 = vector.broadcast %54 : vector<16x1xf32> to vector<16x256xf32>
    %56 = arith.subf %52, %55 : vector<16x256xf32>
    %57 = math.exp %56 : vector<16x256xf32>
    %cst_18 = arith.constant dense<0.000000e+00> : vector<16xf32>
    %58 = vector.multi_reduction <add>, %57, %cst_18 [1] : vector<16x256xf32> to vector<16xf32>
    %59 = vector.shape_cast %58 : vector<16xf32> to vector<16x1xf32>
    %60 = tpu.reciprocal %59 {approx = true} : vector<16x1xf32> -> vector<16x1xf32>
    %61 = vector.broadcast %60 : vector<16x1xf32> to vector<16x256xf32>
    %62 = arith.mulf %57, %61 : vector<16x256xf32>
    %63 = arith.subf %49, %62 : vector<16x256xf32>
    %64 = math.absf %63 : vector<16x256xf32>
    %cst_19 = arith.constant dense<0.000000e+00> : vector<16xf32>
    %65 = vector.multi_reduction <add>, %64, %cst_19 [1] : vector<16x256xf32> to vector<16xf32>
    %66 = vector.shape_cast %65 : vector<16xf32> to vector<16x1xf32>
    %cst_20 = arith.constant dense<0.000000e+00> : vector<1xf32>
    %67 = vector.multi_reduction <add>, %66, %cst_20 [0] : vector<16x1xf32> to vector<1xf32>
    %68 = vector.shape_cast %67 : vector<1xf32> to vector<1x1xf32>
    %69 = arith.mulf %62, %28 : vector<16x256xf32>
    %cst_21 = arith.constant dense<0.000000e+00> : vector<16xf32>
    %70 = vector.multi_reduction <add>, %69, %cst_21 [1] : vector<16x256xf32> to vector<16xf32>
    %71 = vector.shape_cast %70 : vector<16xf32> to vector<16x1xf32>
    %c0_22 = arith.constant 0 : index
    %c0_23 = arith.constant 0 : index
    %72 = vector.load %arg7[%c0_22, %c0_23] : memref<1x32xf32, #tpu.memory_space<vmem>>, vector<1x32xf32>
    %73 = vector.broadcast %71 : vector<16x1xf32> to vector<16x32xf32>
    %74 = vector.broadcast %72 : vector<1x32xf32> to vector<16x32xf32>
    %75 = arith.mulf %73, %74 : vector<16x32xf32>
    %c0_24 = arith.constant 0 : index
    %c0_25 = arith.constant 0 : index
    %76 = vector.load %arg6[%c0_24, %c0_25] : memref<256x32xf32, #tpu.memory_space<vmem>>, vector<256x32xf32>
    %cst_26 = arith.constant dense<0.000000e+00> : vector<16x32xf32>
    %77 = tpu.matmul %62, %76, %cst_26 {dimension_numbers = #tpu.dot_dimension_numbers<[1], [0], [0], [1], [0, 0, 1, 1], [], []>} : vector<16x256xf32>, vector<256x32xf32>, vector<16x32xf32> -> vector<16x32xf32>
    %78 = arith.addf %75, %77 : vector<16x32xf32>
    %c0_27 = arith.constant 0 : index
    %c0_28 = arith.constant 0 : index
    %79 = vector.load %arg8[%c0_27, %c0_28] : memref<32x128xf32, #tpu.memory_space<vmem>>, vector<32x128xf32>
    %cst_29 = arith.constant dense<0.000000e+00> : vector<16x128xf32>
    %80 = tpu.matmul %78, %79, %cst_29 {dimension_numbers = #tpu.dot_dimension_numbers<[1], [0], [0], [1], [0, 0, 1, 1], [], []>} : vector<16x32xf32>, vector<32x128xf32>, vector<16x128xf32> -> vector<16x128xf32>
    %81 = tpu.iota {dimensions = array<i32: 1>} : vector<16x128xi32>
    %c63_i32 = arith.constant 63 : i32
    %82 = vector.broadcast %c63_i32 : i32 to vector<16x128xi32>
    %83 = arith.cmpi slt, %81, %82 : vector<16x128xi32>
    %cst_30 = arith.constant -1.000000e+09 : f32
    %84 = vector.broadcast %cst_30 : f32 to vector<16x128xf32>
    %85 = arith.select %83, %80, %84 : vector<16x128xi1>, vector<16x128xf32>
    %cst_31 = arith.constant dense<0xFF800000> : vector<16xf32>
    %86 = vector.multi_reduction <maximumf>, %85, %cst_31 [1] : vector<16x128xf32> to vector<16xf32>
    %87 = vector.shape_cast %86 : vector<16xf32> to vector<16x1xf32>
    %88 = vector.broadcast %87 : vector<16x1xf32> to vector<16x128xf32>
    %89 = arith.subf %85, %88 : vector<16x128xf32>
    %90 = math.exp %89 : vector<16x128xf32>
    %cst_32 = arith.constant dense<0.000000e+00> : vector<16xf32>
    %91 = vector.multi_reduction <add>, %90, %cst_32 [1] : vector<16x128xf32> to vector<16xf32>
    %92 = vector.shape_cast %91 : vector<16xf32> to vector<16x1xf32>
    %93 = math.log %92 : vector<16x1xf32>
    %94 = arith.addf %93, %87 : vector<16x1xf32>
    %c0_33 = arith.constant 0 : index
    %c0_34 = arith.constant 0 : index
    %95 = vector.load %arg3[%c0_33, %c0_34] : memref<16x1xi32, #tpu.memory_space<vmem>>, vector<16x1xi32>
    %96 = vector.broadcast %95 : vector<16x1xi32> to vector<16x128xi32>
    %97 = arith.cmpi eq, %81, %96 : vector<16x128xi32>
    %cst_35 = arith.constant 0.000000e+00 : f32
    %98 = vector.broadcast %cst_35 : f32 to vector<16x128xf32>
    %99 = arith.select %97, %85, %98 : vector<16x128xi1>, vector<16x128xf32>
    %cst_36 = arith.constant dense<0.000000e+00> : vector<16xf32>
    %100 = vector.multi_reduction <add>, %99, %cst_36 [1] : vector<16x128xf32> to vector<16xf32>
    %101 = vector.shape_cast %100 : vector<16xf32> to vector<16x1xf32>
    %102 = arith.subf %94, %101 : vector<16x1xf32>
    %cst_37 = arith.constant dense<0.000000e+00> : vector<1xf32>
    %103 = vector.multi_reduction <add>, %102, %cst_37 [0] : vector<16x1xf32> to vector<1xf32>
    %104 = vector.shape_cast %103 : vector<1xf32> to vector<1x1xf32>
    %cst_38 = arith.constant 0.00244140625 : f32
    %105 = vector.broadcast %cst_38 : f32 to vector<1x1xf32>
    %106 = arith.mulf %68, %105 : vector<1x1xf32>
    %cst_39 = arith.constant 6.250000e-05 : f32
    %107 = vector.broadcast %cst_39 : f32 to vector<1x1xf32>
    %108 = arith.mulf %104, %107 : vector<1x1xf32>
    %109 = arith.addf %106, %108 : vector<1x1xf32>
    %c0_40 = arith.constant 0 : index
    %c0_41 = arith.constant 0 : index
    %c0_42 = arith.constant 0 : index
    %110 = vector.load %arg9[%c0_40, %c0_41, %c0_42] : memref<1x1x1xf32, #tpu.memory_space<vmem>>, vector<1x1x1xf32>
    %111 = vector.shape_cast %110 : vector<1x1x1xf32> to vector<1x1xf32>
    %112 = vector.shape_cast %109 : vector<1x1xf32> to vector<1x1x1xf32>
    tpu.vector_store %arg9[%c0_40, %c0_41, %c0_42], %112 {strides = array<i32>} : memref<1x1x1xf32, #tpu.memory_space<vmem>>, vector<1x1x1xf32>,
    return
  }
  func.func @transform_0(%arg0: i32) -> (i32, i32, i32) {
    %c0_i32 = arith.constant 0 : i32
    %c0_i32_0 = arith.constant 0 : i32
    %c0_i32_1 = arith.constant 0 : i32
    return %arg0, %c0_i32, %c0_i32_0 : i32, i32, i32
  }
  func.func @transform_1(%arg0: i32) -> (i32, i32) {
    %c0_i32 = arith.constant 0 : i32
    %c0_i32_0 = arith.constant 0 : i32
    return %arg0, %c0_i32 : i32, i32
  }
  func.func @transform_2(%arg0: i32) -> (i32, i32) {
    %c0_i32 = arith.constant 0 : i32
    %c0_i32_0 = arith.constant 0 : i32
    return %arg0, %c0_i32 : i32, i32
  }
  func.func @transform_3(%arg0: i32) -> (i32, i32) {
    %c0_i32 = arith.constant 0 : i32
    %c0_i32_0 = arith.constant 0 : i32
    %c0_i32_1 = arith.constant 0 : i32
    return %c0_i32, %c0_i32_0 : i32, i32
  }
  func.func @transform_4(%arg0: i32) -> (i32, i32) {
    %c0_i32 = arith.constant 0 : i32
    %c0_i32_0 = arith.constant 0 : i32
    %c0_i32_1 = arith.constant 0 : i32
    return %c0_i32, %c0_i32_0 : i32, i32
  }
  func.func @transform_5(%arg0: i32) -> (i32, i32) {
    %c0_i32 = arith.constant 0 : i32
    %c0_i32_0 = arith.constant 0 : i32
    %c0_i32_1 = arith.constant 0 : i32
    return %c0_i32, %c0_i32_0 : i32, i32
  }
  func.func @transform_6(%arg0: i32) -> (i32, i32) {
    %c0_i32 = arith.constant 0 : i32
    %c0_i32_0 = arith.constant 0 : i32
    %c0_i32_1 = arith.constant 0 : i32
    return %c0_i32, %c0_i32_0 : i32, i32
  }
  func.func @transform_7(%arg0: i32) -> (i32, i32) {
    %c0_i32 = arith.constant 0 : i32
    %c0_i32_0 = arith.constant 0 : i32
    %c0_i32_1 = arith.constant 0 : i32
    return %c0_i32, %c0_i32_0 : i32, i32
  }
  func.func @transform_8(%arg0: i32) -> (i32, i32, i32) {
    %c0_i32 = arith.constant 0 : i32
    %c0_i32_0 = arith.constant 0 : i32
    %c0_i32_1 = arith.constant 0 : i32
    return %arg0, %c0_i32, %c0_i32_0 : i32, i32, i32
  }
}

</mosaic_0001>

<bundles_post_ra>
// kernel: tpu_custom_call.1
= control target key start
LH: loop header
LB: loop body
LE: loop exit
PB: predicated region body
PF: predicated region fallthrough
CT: control target
= control target key end

     0   :  { %v768_v7 = vmov 0.0   ;;  %s1050_s0 = inlined_call_operand.vmem [shape: f32[2,6,256], index: 0, kind: input, shape index: {}]   ;;  %s1051_s1 = inlined_call_operand.vmem [shape: f32[16,32], index: 1, kind: input, shape index: {}]   ;;  %s1052_s2 = inlined_call_operand.vmem [shape: s32[16,1], index: 2, kind: input, shape index: {}]   ;;  %s1053_s3 = inlined_call_operand.vmem [shape: f32[32,256], index: 3, kind: input, shape index: {}]   ;;  %s1054_s4 = inlined_call_operand.vmem [shape: f32[1,32], index: 4, kind: input, shape index: {}]   ;;  %s1055_s5 = inlined_call_operand.vmem [shape: f32[256,32], index: 5, kind: input, shape index: {}]   ;;  %s1056_s6 = inlined_call_operand.vmem [shape: f32[1,32], index: 6, kind: input, shape index: {}]   ;;  %s1057_s7 = inlined_call_operand.vmem [shape: f32[32,128], index: 7, kind: input, shape index: {}]   ;;  %s1058_s8 = inlined_call_operand.hbm [shape: f32[1,1,1], index: 8, kind: output, shape index: {}]  }
   0x1   :  { %v113_v0 = vld [vmem:[%s1053_s3 + $0x8] sm:$0xff]  ;;  %v115_v1 = vld [vmem:[%s1053_s3 + $0x18] sm:$0xff]  ;;  %v112_v2 = vld [vmem:[%s1053_s3] sm:$0xff]  ;;  %191 = vmatprep.mubr.f32.mxu0 %v768_v7 }
   0x2   :  { %v659_v3 = vpack.c.bf16 %v115_v1, %v113_v0  ;;  %v114_v4 = vld [vmem:[%s1053_s3 + $0x10] sm:$0xff]  ;;  %v117_v5 = vld [vmem:[%s1053_s3 + $0x28] sm:$0xff]  ;;  %v119_v6 = vld [vmem:[%s1053_s3 + $0x38] sm:$0xff] }
   0x3   :  { %v661_v8 = vpack.c.bf16 %v114_v4, %v112_v2  ;;  %v663_v9 = vpack.c.bf16 %v119_v6, %v117_v5  ;;  %v116_v10 = vld [vmem:[%s1053_s3 + $0x20] sm:$0xff]  ;;  %v118_v11 = vld [vmem:[%s1053_s3 + $0x30] sm:$0xff]  ;;  %v111_v13 = vld [vmem:[%s1051_s1 + $0x8] sm:$0xff] }
   0x4   :  { %v110_v12 = vld [vmem:[%s1051_s1] sm:$0xff]  ;;  %660 = vmatprep.subr.bf16.mxu0 %v659_v3 }
   0x5   :  { %v600_v14 = vld [vmem:[%s1054_s4] ss:$0 sm:$0xff] }
   0x6   :  { %13 = vsyncpa [#allocation3], 0  ;;  %662 = vmatpush1.bf16.msra.mxu0 %v661_v8  ;;  %v665_v15 = vpack.c.bf16 %v118_v11, %v116_v10  ;;  %v211_v16 = vmul.f32 %v600_v14, %v110_v12  ;;  %v212_v17 = vmul.f32 %v600_v14, %v111_v13  ;;  %vm120_vm0 = vcmask 261120   ;;  %v30_v20 = vld [vmem:[%s1050_s0] sm:$0x3f] }
   0x7   :  { %664 = vmatprep.subr.bf16.mxu0 %v663_v9  ;;  %v78_v21 = vlaneseq  ;;  %v34_v22 = vmul.f32 0.299, %v30_v20  ;;  %v38_v23 = vmul.f32 0.587, %v30_v20  ;;  %v58_v24 = vmul.f32 0.114, %v30_v20 }
   0x8   :  { %v213_v18 = vsel %vm120_vm0, %v211_v16, 0.0  ;;  %v216_v19 = vsel %vm120_vm0, %v212_v17, 0.0  ;;  %v31_v32 = vld [vmem:[%s1050_s0 + $0x8] sm:$0x3f]  ;;  %v32_v37 = vld [vmem:[%s1050_s0 + $0x10] sm:$0x3f] }
   0x9   :  { %214 = vadd.xlane.f32.xlu0 %v213_v18  ;;  %v79_v25 = vshrl.u32 %v78_v21, 7  ;;  %v46_v26 = vrot.slane %v38_v23, 1  ;;  %v66_v27 = vrot.slane %v58_v24, 2  ;;  %v39_v33 = vmul.f32 0.587, %v31_v32 }
   0xa   :  { %666 = vmatpush1.bf16.msra.mxu0 %v665_v15  ;;  %v35_v34 = vmul.f32 0.299, %v31_v32  ;;  %v59_v36 = vmul.f32 0.114, %v31_v32  ;;  %v33_v38 = vld [vmem:[%s1050_s0 + $0x18] sm:$0x3f] }
   0xb   :  { %v54_v28 = vadd.f32 %v46_v26, %v34_v22  ;;  %v80_v29 = vsub.s32 0, %v79_v25  ;;  %v47_v35 = vrot.slane %v39_v33, 1  ;;  %v40_v41 = vmul.f32 0.587, %v32_v37  ;;  %v352_v26 = vld [vmem:[%s1055_s5 + $0x88] sm:$0xff] }
   0xc   :  { %v67_v40 = vrot.slane %v59_v36, 2  ;;  %v41_v42 = vmul.f32 0.587, %v33_v38  ;;  %v36_v43 = vmul.f32 0.299, %v32_v37  ;;  %v96_v62 = vsub.s32 3, %v79_v25 }
   0xd   :  { %598 = vmatmul.mubr.msk.f32.vlgmr.msra.gmra.mrb[0].mxu0 %vm120_vm0, %v110_v12  ;;  %217 = vadd.xlane.f32.xlu0 %v216_v19  ;;  %v74_v30 = vadd.f32 %v66_v27, %v54_v28  ;;  %v55_v39 = vadd.f32 %v47_v35, %v35_v34  ;;  %v60_v44 = vmul.f32 0.114, %v32_v37  ;;  %v48_v46 = vrot.slane %v40_v41, 1  ;;  %v351_v25 = vld [vmem:[%s1055_s5 + $0x80] sm:$0xff]  ;;  %v337_v34 = vld [vmem:[%s1055_s5 + $0x10] sm:$0xff]  ;;  %v338_v35 = vld [vmem:[%s1055_s5 + $0x18] sm:$0xff] }
   0xe   :  { %197 = vmatprep.mubr.f32.mxu0 %v768_v7  ;;  %v37_v47 = vmul.f32 0.299, %v33_v38  ;;  %v49_v48 = vrot.slane %v41_v42, 1  ;;  %v61_v50 = vmul.f32 0.114, %v33_v38  ;;  %v335_v27 = vld [vmem:[%s1055_s5] sm:$0xff]  ;;  %v667_v28 = vpack.c.bf16 %v352_v26, %v351_v25 }
   0xf   :  { %v81_v31 = vrot.slane %v74_v30, %v80_v29  ;;  %v75_v45 = vadd.f32 %v67_v40, %v55_v39  ;;  %v68_v49 = vrot.slane %v60_v44, 2  ;;  %v56_v52 = vadd.f32 %v48_v46, %v36_v43  ;;  %v355_v36 = vld [vmem:[%s1055_s5 + $0xa0] sm:$0xff]  ;;  %v356_v37 = vld [vmem:[%s1055_s5 + $0xa8] sm:$0xff]  ;;  %v357_v42 = vld [vmem:[%s1055_s5 + $0xb0] sm:$0xff] }
  0x10   :  { %v57_v53 = vadd.f32 %v49_v48, %v37_v47  ;;  %v69_v54 = vrot.slane %v61_v50, 2  ;;  %v866_v63 = vrot.slane %v74_v30, %v96_v62  ;;  %v353_v30 = vld [vmem:[%s1055_s5 + $0x90] sm:$0xff]  ;;  %668 = vmatprep.subr.bf16.mxu1 %v667_v28  ;;  %v673_v38 = vpack.c.bf16 %v338_v35, %v337_v34  ;;  %v339_v40 = vld [vmem:[%s1055_s5 + $0x20] sm:$0xff]  ;;  %v340_v41 = vld [vmem:[%s1055_s5 + $0x28] sm:$0xff] }
  0x11   :  { %599 = vmatmul.mubr.msk.f32.gmra.mrb[2].mxu0 %vm120_vm0, %v111_v13  ;;  %v85_v51 = vrot.slane %v75_v45, %v80_v29  ;;  %v76_v55 = vadd.f32 %v68_v49, %v56_v52  ;;  %v868_v0 = vrot.slane %v75_v45, %v96_v62  ;;  %v675_v39 = vpack.c.bf16 %v356_v37, %v355_v36  ;;  %v358_v43 = vld [vmem:[%s1055_s5 + $0xb8] sm:$0xff]  ;;  %v341_v46 = vld [vmem:[%s1055_s5 + $0x30] sm:$0xff]  ;;  %v359_v48 = vld [vmem:[%s1055_s5 + $0xc0] sm:$0xff] }
  0x12   :  { %v77_v56 = vadd.f32 %v69_v54, %v57_v53  ;;  %v677_v44 = vpack.c.bf16 %v340_v41, %v339_v40  ;;  %v679_v45 = vpack.c.bf16 %v358_v43, %v357_v42  ;;  %v342_v47 = vld [vmem:[%s1055_s5 + $0x38] sm:$0xff]  ;;  %v360_v49 = vld [vmem:[%s1055_s5 + $0xc8] sm:$0xff]  ;;  %v343_v52 = vld [vmem:[%s1055_s5 + $0x40] sm:$0xff]  ;;  %vm582_vm4 = vcmask 0  }
  0x13   :  { %v89_v57 = vrot.slane %v76_v55, %v80_v29  ;;  %v871_v2 = vrot.slane %v76_v55, %v96_v62  ;;  %v681_v50 = vpack.c.bf16 %v342_v47, %v341_v46  ;;  %v344_v53 = vld [vmem:[%s1055_s5 + $0x48] sm:$0xff]  ;;  %v347_v25 = vld [vmem:[%s1055_s5 + $0x60] sm:$0xff] }
  0x14   :  { %v93_v58 = vrot.slane %v77_v56, %v80_v29  ;;  %v874_v5 = vrot.slane %v77_v56, %v96_v62  ;;  %v336_v29 = vld [vmem:[%s1055_s5 + $0x8] sm:$0xff]  ;;  %v685_v54 = vpack.c.bf16 %v344_v53, %v343_v52  ;;  %v601_v52 = vld [vmem:[%s1056_s6] ss:$0 sm:$0xff] }
  0x15   :  { %v669_v32 = vpack.c.bf16 %v336_v29, %v335_v27  ;;  %v348_v26 = vld [vmem:[%s1055_s5 + $0x68] sm:$0xff]  ;;  %v365_v27 = vld [vmem:[%s1055_s5 + $0xf0] sm:$0xff]  ;;  %v366_v29 = vld [vmem:[%s1055_s5 + $0xf8] sm:$0xff] }
  0x16   :  { %v693_v28 = vpack.c.bf16 %v348_v26, %v347_v25 }
  0x17   :  { %670 = vmatpush3.bf16.msra.mxu1 %v669_v32  ;;  %v695_v32 = vpack.c.bf16 %v366_v29, %v365_v27 }
  0x96   :  { %v215_v59 = vpop.xlane.xlu0 %214 }
  0x97   :  { %v219_v60 = vmul.f32 %v215_v59, %v81_v31  ;;  %v220_v61 = vmul.f32 %v215_v59, %v85_v51  ;;  %v257_v1 = vmul.f32 %v215_v59, %v866_v63  ;;  %v258_v3 = vmul.f32 %v215_v59, %v868_v0  ;;  %v354_v31 = vld [vmem:[%s1055_s5 + $0x98] sm:$0xff] }
  0x98   :  { %v671_v33 = vpack.c.bf16 %v354_v31, %v353_v30  ;;  %v683_v51 = vpack.c.bf16 %v360_v49, %v359_v48  ;;  %v349_v30 = vld [vmem:[%s1055_s5 + $0x70] sm:$0xff]  ;;  %v350_v31 = vld [vmem:[%s1055_s5 + $0x78] sm:$0xff]  ;;  %v444_v48 = vld [vmem:[%s1057_s7] sm:$0xff] }
  0x99   :  { %v446_v49 = vld [vmem:[%s1057_s7 + $0x10] sm:$0xff] }
  0x9a   :  { %v218_v4 = vpop.xlane.xlu0 %217  ;;  %672 = vmatprep.subr.bf16.mxu1 %v671_v33  ;;  %v697_v33 = vpack.c.bf16 %v350_v31, %v349_v30 }
  0x9b   :  { %v221_v10 = vmul.f32 %v218_v4, %v89_v57  ;;  %v259_v11 = vmul.f32 %v218_v4, %v871_v2  ;;  %v222_v14 = vmul.f32 %v218_v4, %v93_v58  ;;  %v260_v15 = vmul.f32 %v218_v4, %v874_v5  ;;  %674 = vmatpush3.bf16.msra.mxu1 %v673_v38 }
  0x9c   :  { %676 = vmatprep.subr.bf16.mxu1 %v675_v39 }
  0x9f   :  { %678 = vmatpush3.bf16.msra.mxu1 %v677_v44 }
  0xa0   :  { %680 = vmatprep.subr.bf16.mxu1 %v679_v45 }
  0xa3   :  { %682 = vmatpush3.bf16.msra.mxu1 %v681_v50  ;;  %v447_v50 = vld [vmem:[%s1057_s7 + $0x18] sm:$0xff] }
  0xa4   :  { %684 = vmatprep.subr.bf16.mxu1 %v683_v51  ;;  %v703_v51 = vpack.c.bf16 %v447_v50, %v446_v49 }
  0xa7   :  { %686 = vmatpush3.bf16.msra.mxu1 %v685_v54 }
  0xe0   :  { %v193_v6 = vpop.f32.mrb[0].mxu0 }
  0xe1   :  { %v876_v7 = vadd.f32 %v219_v60, %v193_v6  ;;  %v261_v8 = vadd.f32 %v257_v1, %v193_v6  ;;  %v195_v9 = vpop.f32.mrb[1].mxu0 }
  0xe2   :  { %v879_v12 = vadd.f32 %v220_v61, %v195_v9  ;;  %v262_v13 = vadd.f32 %v258_v3, %v195_v9 }
  0xe4   :  { %v199_v16 = vpop.f32.mrb[2].mxu0  ;;  %v265_v17 = vmax.f32 %v261_v8, %v262_v13  ;;  %v227_v46 = vmax.f32 %v876_v7, %v879_v12 }
  0xe5   :  { %v882_v18 = vadd.f32 %v221_v10, %v199_v16  ;;  %v263_v19 = vadd.f32 %v259_v11, %v199_v16  ;;  %v201_v20 = vpop.f32.mrb[3].mxu0  ;;  %v345_v16 = vld [vmem:[%s1055_s5 + $0x50] sm:$0xff] }
  0xe6   :  { %v884_v22 = vadd.f32 %v222_v14, %v201_v20  ;;  %v264_v23 = vadd.f32 %v260_v15, %v201_v20  ;;  %266 = vmax.xlane.f32.xlu1 %v265_v17  ;;  %v346_v17 = vld [vmem:[%s1055_s5 + $0x58] sm:$0xff]  ;;  %v363_v20 = vld [vmem:[%s1055_s5 + $0xe0] sm:$0xff] }
  0xe8   :  { %v268_v24 = vmax.f32 %v263_v19, %v264_v23  ;;  %v230_v47 = vmax.f32 %v882_v18, %v884_v22 }
  0xea   :  { %269 = vmax.xlane.f32.xlu1 %v268_v24 }
 0x173   :  { %v267_v55 = vpop.xlane.xlu1 %266 }
 0x174   :  { %v271_v56 = vsub.f32 %v261_v8, %v267_v55  ;;  %v272_v57 = vsub.f32 %v262_v13, %v267_v55  ;;  %v361_v8 = vld [vmem:[%s1055_s5 + $0xd0] sm:$0xff]  ;;  %v362_v13 = vld [vmem:[%s1055_s5 + $0xd8] sm:$0xff] }
 0x175   :  { %v687_v15 = vpack.c.bf16 %v362_v13, %v361_v8 }
 0x176   :  { %v275_v58 = vmul.f32 1.442695, %v271_v56  ;;  %v277_v59 = vmul.f32 1.442695, %v272_v57 }
 0x177   :  { %v270_v60 = vpop.xlane.xlu1 %269  ;;  %688 = vmatprep.subr.bf16.mxu1 %v687_v15 }
 0x178   :  { %712 = vpow2.f32 %v275_v58  ;;  %v273_v61 = vsub.f32 %v263_v19, %v270_v60  ;;  %v274_v62 = vsub.f32 %v264_v23, %v270_v60  ;;  %v689_v19 = vpack.c.bf16 %v346_v17, %v345_v16  ;;  %v364_v23 = vld [vmem:[%s1055_s5 + $0xe8] sm:$0xff] }
 0x179   :  { %714 = vpow2.f32 %v277_v59  ;;  %v691_v24 = vpack.c.bf16 %v364_v23, %v363_v20 }
 0x17a   :  { %v279_v1 = vmul.f32 1.442695, %v273_v61  ;;  %v281_v3 = vmul.f32 1.442695, %v274_v62  ;;  %690 = vmatpush3.bf16.msra.mxu1 %v689_v19  ;;  %v530_v19 = vand.u32 127, %v78_v21  ;;  %v554_v21 = vld [vmem:[%s1052_s2] sm:$0xff] }
 0x17b   :  { %692 = vmatprep.subr.bf16.mxu1 %v691_v24 }
 0x17c   :  { %716 = vpow2.f32 %v279_v1  ;;  %vm531_vm1 = vcmp.lt.s32.totalorder %v530_v19, 63 }
 0x17d   :  { %718 = vpow2.f32 %v281_v3 }
 0x17e   :  { %694 = vmatpush3.bf16.msra.mxu1 %v693_v28  ;;  %v555_v28 = vld [vmem:[%s1052_s2 + $0x8] sm:$0xff]  ;;  %s770_s2 = smov [#allocation2]  }
 0x17f   :  { %696 = vmatprep.subr.bf16.mxu1 %v695_v32  ;;  %s590_s29 = sshll.u32 %s770_s2, 4  ;;  %s591_s29 = int_to_ptr.vmem [resolvable:$true] %s590_s29 }
 0x180   :  { %s744_s30 = scalar_lea.vmem %s591_s29, 16  ;;  %s748_s9 = scalar_lea.vmem %s591_s29, 32 }
 0x181   :  { %p745_p0 = scmp.ne.s32.totalorder %s591_s29, %s744_s30  ;;  %p749_p1 = scmp.lt.s32.totalorder %s591_s29, %s591_s29 }
 0x182   :  { %v713_v4 = vpop.eup %712  ;;  %698 = vmatpush3.bf16.msra.mxu1 %v697_v33  ;;  %p750_p2 = scmp.lt.s32.totalorder %s748_s9, %s744_s30 }
 0x183   :  { %v715_v6 = vpop.eup %714 }
 0x184   :  { %v283_v9 = vadd.f32 %v715_v6, %v713_v4  ;;  %p751_p3 = por %p750_p2, %p749_p1 }
 0x186   :  { %v717_v10 = vpop.eup %716  ;;  %284 = vadd.xlane.f32.xlu0 %v283_v9  ;;  %p752_p4 = pnand %p751_p3, %p745_p0 }
 0x187   :  { %v719_v11 = vpop.eup %718 }
 0x188   :  { %v286_v14 = vadd.f32 %v719_v11, %v717_v10 }
 0x18a   :  { %287 = vadd.xlane.f32.xlu1 %v286_v14 }
 0x213   :  { %v285_v34 = vpop.xlane.xlu0 %284 }
 0x214   :  { %720 = vrcp.f32 %v285_v34 }
 0x217   :  { %v288_v35 = vpop.xlane.xlu1 %287 }
 0x218   :  { %722 = vrcp.f32 %v288_v35 }
 0x21e   :  { %v721_v36 = vpop.eup %720 }
 0x21f   :  { %v982_v37 = vmul.f32 %v721_v36, %v715_v6  ;;  %v984_v38 = vmul.f32 %v721_v36, %v713_v4  ;;  %v769_v4 = vmov 0  }
 0x220   :  { %711 = vset.pattern.permute.xlu1 %v769_v4  ;;  %710 = vset.pattern.permute.xlu0 %v769_v4 }
 0x221   :  { %431 = vmatprep.mubr.f32.mxu1 %v982_v37  ;;  %v316_v39 = vmul.f32 %v984_v38, %v866_v63  ;;  %v317_v40 = vmul.f32 %v982_v37, %v868_v0 }
 0x222   :  { %v723_v41 = vpop.eup %722  ;;  %432 = vmatmul.mubr.f32.vlgmr.msra.gmra.mrb[0].mxu1 %v984_v38 }
 0x223   :  { %v320_v42 = vadd.f32 %v317_v40, %v316_v39  ;;  %v992_v43 = vmul.f32 %v723_v41, %v719_v11  ;;  %v994_v44 = vmul.f32 %v723_v41, %v717_v10 }
 0x225   :  { %321 = vadd.xlane.f32.xlu0 %v320_v42  ;;  %436 = vmatprep.mubr.f32.mxu1 %v992_v43  ;;  %v318_v45 = vmul.f32 %v994_v44, %v871_v2  ;;  %v319_v63 = vmul.f32 %v992_v43, %v874_v5  ;;  %v445_v2 = vld [vmem:[%s1057_s7 + $0x8] sm:$0xff] }
 0x226   :  { %437 = vmatmul.mubr.f32.gmra.mrb[2].mxu1 %v994_v44  ;;  %v699_v5 = vpack.c.bf16 %v445_v2, %v444_v48 }
 0x227   :  { %v323_v0 = vadd.f32 %v319_v63, %v318_v45 }
 0x228   :  { %700 = vmatprep.subr.bf16.mxu0 %v699_v5 }
 0x229   :  { %324 = vadd.xlane.f32.xlu1 %v323_v0  ;;  %228 = vmax.xlane.f32.xlu0 %v227_v46 }
 0x22a   :  { %702 = vmatpush3.bf16.msra.mxu0 %v699_v5 }
 0x22b   :  { %704 = vmatprep.subr.bf16.mxu0 %v703_v51 }
 0x22d   :  { %231 = vmax.xlane.f32.xlu1 %v230_v47 }
 0x22e   :  { %706 = vmatpush3.bf16.msra.mxu0 %v703_v51 }
 0x2b2   :  { %v322_v53 = vpop.xlane.xlu0 %321 }
 0x2b3   :  { %v333_v56 = vmul.f32 %v601_v52, %v322_v53 }
 0x2b6   :  { %v325_v58 = vpop.xlane.xlu1 %324  ;;  %v229_v6 = vpop.xlane.xlu0 %228 }
 0x2b7   :  { %v334_v62 = vmul.f32 %v601_v52, %v325_v58  ;;  %v233_v10 = vsub.f32 %v876_v7, %v229_v6  ;;  %v234_v8 = vsub.f32 %v879_v12, %v229_v6 }
 0x2b9   :  { %v237_v13 = vmul.f32 1.442695, %v233_v10  ;;  %v239_v17 = vmul.f32 1.442695, %v234_v8 }
 0x2ba   :  { %v232_v9 = vpop.xlane.xlu1 %231 }
 0x2bb   :  { %v235_v11 = vsub.f32 %v882_v18, %v232_v9  ;;  %v236_v14 = vsub.f32 %v884_v22, %v232_v9  ;;  %724 = vpow2.f32 %v237_v13 }
 0x2bd   :  { %v241_v15 = vmul.f32 1.442695, %v235_v11  ;;  %v243_v16 = vmul.f32 1.442695, %v236_v14 }
 0x2bf   :  { %726 = vpow2.f32 %v241_v15 }
 0x2c0   :  { %728 = vpow2.f32 %v243_v16 }
 0x2c1   :  { %730 = vpow2.f32 %v239_v17 }
 0x2c5   :  { %v725_v20 = vpop.eup %724 }
 0x2c9   :  { %v727_v23 = vpop.eup %726 }
 0x2ca   :  { %v729_v24 = vpop.eup %728 }
 0x2cb   :  { %v731_v22 = vpop.eup %730  ;;  %v248_v12 = vadd.f32 %v729_v24, %v727_v23 }
 0x2cc   :  { %v245_v27 = vadd.f32 %v731_v22, %v725_v20 }
 0x2f5   :  { %v636_v54 = vpop.f32.mrb[0].mxu1 }
 0x2f6   :  { %v637_v55 = vpop.f32.mrb[1].mxu1 }
 0x2f7   :  { %v638_v57 = vadd.f32 %v637_v55, %v636_v54 }
 0x2f9   :  { %v442_v59 = vadd.f32 %v638_v57, %v333_v56  ;;  %v639_v60 = vpop.f32.mrb[2].mxu1 }
 0x2fa   :  { %v640_v61 = vpop.f32.mrb[3].mxu1 }
 0x2fb   :  { %v641_v1 = vadd.f32 %v640_v61, %v639_v60  ;;  %656 = vmatprep.mubr.msk.f32.mxu0 %vm120_vm0, %v442_v59 }
 0x2fd   :  { %v443_v3 = vadd.f32 %v641_v1, %v334_v62 }
 0x2ff   :  { %657 = vmatmul.mubr.msk.f32.vlgmr.msra.gmra.mrb[4].mxu0 %vm120_vm0, %v443_v3 }
 0x3d2   :  { %v658_v7 = vpop.f32.mrb[4].mxu0 }
 0x3d3   :  { %v533_v18 = vsel %vm531_vm1, %v658_v7, -1e+09  ;;  %v520_v25 = vpop.f32.mrb[5].mxu0 }
 0x3d4   :  { %v532_v26 = vsel %vm531_vm1, %v520_v25, -1e+09  ;;  %536 = vmax.xlane.f32.xlu1 %v533_v18 }
 0x3d5   :  { %534 = vmax.xlane.f32.xlu0 %v532_v26 }
 0x3d8   :  { %249 = vadd.xlane.f32.xlu1 %v248_v12 }
 0x3d9   :  { %246 = vadd.xlane.f32.xlu0 %v245_v27 }
 0x3e9   :  { %560 = vperm.xlu1 %711, %v555_v28  }
 0x3ef   :  { %557 = vperm.xlu0 %710, %v554_v21  }
 0x461   :  { %v537_v29 = vpop.xlane.xlu1 %536 }
 0x462   :  { %v539_v30 = vsub.f32 %v533_v18, %v537_v29  ;;  %v535_v31 = vpop.xlane.xlu0 %534 }
 0x463   :  { %v538_v32 = vsub.f32 %v532_v26, %v535_v31 }
 0x464   :  { %v542_v33 = vmul.f32 1.442695, %v539_v30 }
 0x465   :  { %v540_v34 = vmul.f32 1.442695, %v538_v32  ;;  %v250_v35 = vpop.xlane.xlu1 %249 }
 0x466   :  { %732 = vpow2.f32 %v542_v33  ;;  %v247_v36 = vpop.xlane.xlu0 %246 }
 0x467   :  { %734 = vpow2.f32 %v540_v34 }
 0x468   :  { %736 = vrcp.f32 %v250_v35 }
 0x469   :  { %738 = vrcp.f32 %v247_v36  ;;  %v561_v63 = vpop.permute.xlu1 %560 }
 0x46a   :  { %vm563_vm3 = vcmp.eq.s32.totalorder %v530_v19, %v561_v63 }
 0x46b   :  { %v565_v54 = vsel %vm563_vm3, %v533_v18, 0.0 }
 0x46e   :  { %v558_v39 = vpop.permute.xlu0 %557 }
 0x46f   :  { %vm562_vm2 = vcmp.eq.s32.totalorder %v530_v19, %v558_v39 }
 0x470   :  { %v733_v40 = vpop.eup %732  ;;  %v564_v2 = vsel %vm562_vm2, %v532_v26, 0.0 }
 0x471   :  { %v735_v41 = vpop.eup %734  ;;  %546 = vadd.xlane.f32.xlu0 %v733_v40 }
 0x472   :  { %v737_v42 = vpop.eup %736  ;;  %544 = vadd.xlane.f32.xlu1 %v735_v41 }
 0x473   :  { %v739_v45 = vpop.eup %738  ;;  %v255_v47 = vmul.f32 %v737_v42, %v727_v23  ;;  %v256_v48 = vmul.f32 %v737_v42, %v729_v24 }
 0x474   :  { %v253_v0 = vmul.f32 %v739_v45, %v725_v20  ;;  %v254_v46 = vmul.f32 %v739_v45, %v731_v22 }
 0x475   :  { %v297_v52 = vsub.f32 %v255_v47, %v994_v44  ;;  %v298_v53 = vsub.f32 %v256_v48, %v992_v43 }
 0x476   :  { %566 = vadd.xlane.f32.xlu1 %v564_v2  ;;  %v295_v5 = vsub.f32 %v253_v0, %v984_v38  ;;  %v296_v49 = vsub.f32 %v254_v46, %v982_v37 }
 0x477   :  { %v301_v56 = vand.u32 2147483647, %v297_v52  ;;  %v302_v57 = vand.u32 2147483647, %v298_v53 }
 0x478   :  { %v299_v50 = vand.u32 2147483647, %v295_v5  ;;  %v300_v51 = vand.u32 2147483647, %v296_v49 }
 0x479   :  { %v306_v58 = vadd.f32 %v302_v57, %v301_v56 }
 0x47a   :  { %568 = vadd.xlane.f32.xlu1 %v565_v54  ;;  %v303_v55 = vadd.f32 %v300_v51, %v299_v50 }
 0x47e   :  { %304 = vadd.xlane.f32.xlu1 %v303_v55 }
 0x482   :  { %307 = vadd.xlane.f32.xlu1 %v306_v58 }
 0x4fe   :  { %v547_v59 = vpop.xlane.xlu0 %546 }
 0x4ff   :  { %740 = vlog2.f32 %v547_v59  ;;  %v545_v60 = vpop.xlane.xlu1 %544 }
 0x500   :  { %742 = vlog2.f32 %v545_v60 }
 0x503   :  { %v567_v38 = vpop.xlane.xlu1 %566 }
 0x507   :  { %v569_v37 = vpop.xlane.xlu1 %568 }
 0x509   :  { %v741_v61 = vpop.eup %740 }
 0x50a   :  { %v743_v62 = vpop.eup %742  ;;  %v551_v1 = vmul.f32 0.6931472, %v741_v61 }
 0x50b   :  { %v549_v44 = vmul.f32 0.6931472, %v743_v62  ;;  %v305_v3 = vpop.xlane.xlu1 %304 }
 0x50c   :  { %v553_v43 = vadd.f32 %v551_v1, %v537_v29 }
 0x50d   :  { %v552_v4 = vadd.f32 %v549_v44, %v535_v31 }
 0x50e   :  { %v571_v6 = vsub.f32 %v553_v43, %v569_v37 }
 0x50f   :  { %v570_v9 = vsub.f32 %v552_v4, %v567_v38  ;;  %v308_v10 = vpop.xlane.xlu1 %307 }
 0x510   :  { %v309_v11 = vadd.f32 %v308_v10, %v305_v3 }
 0x511   :  { %v572_v14 = vadd.f32 %v571_v6, %v570_v9 }
 0x512   :  { %v310_v8 = vrot.slane %v309_v11, 4 }
 0x513   :  { %v573_v13 = vrot.slane %v572_v14, 4 }
 0x514   :  { %v311_v15 = vadd.f32 %v310_v8, %v309_v11 }
 0x515   :  { %v574_v16 = vadd.f32 %v573_v13, %v572_v14 }
 0x516   :  { %v312_v17 = vrot.slane %v311_v15, 2 }
 0x517   :  { %v575_v19 = vrot.slane %v574_v16, 2 }
 0x518   :  { %v313_v20 = vadd.f32 %v312_v17, %v311_v15 }
 0x519   :  { %v576_v23 = vadd.f32 %v575_v19, %v574_v16 }
 0x51a   :  { %v314_v7 = vrot.slane %v313_v20, 1 }
 0x51b   :  { %v577_v24 = vrot.slane %v576_v23, 1 }
 0x51c   :  { %v315_v18 = vadd.f32 %v314_v7, %v313_v20 }
 0x51d   :  { %v578_v25 = vadd.f32 %v577_v24, %v576_v23 }
 0x51e   :  { %v579_v22 = vmul.f32 0.0024414063, %v315_v18 }
 0x51f   :  { %v580_v26 = vmul.f32 6.25e-05, %v578_v25 }
 0x521   :  { %v581_v12 = vadd.f32 %v580_v26, %v579_v22 }
 0x523   :  { %583 = vst.msk [vmem:[#allocation2] sm:$0x1] %vm582_vm4, %v581_v12 }
 0x524   :  { %755 = shalt.err (!%p752_p4)
}
 0x525   :  { %s756_s11 = scalar_lea.hbm %s1058_s8, 16 }
 0x526   :  { %p757_p5 = scmp.ne.s32.totalorder %s1058_s8, %s756_s11  ;;  %p760_p6 = scmp.lt.u32.totalorder %s756_s11, %s1058_s8 }
 0x528   :  { %p762_p7 = pnand %p760_p6, %p757_p5 }
 0x52a   :  { %765 = shalt.err (!%p762_p7)
}
 0x52b   :  { %593 = dma.vmem_to_hbm [thread:$0]  %s591_s29, 16, %s1058_s8, [#allocation3]  }
 0x52c   :  { %766 = dma.done.wait [#allocation3], 16  }
 0x52d   :  { %767 = vsyncadd [#allocation3], 4294967280 }
 0x52e   :  { %597 = vsyncpa [#allocation3], 1 }

</bundles_post_ra>
